<compile_context>
chip_gen: v7x
topology: tpu7x:2x2x1
jax: 0.10.0
libtpu: 0.0.40
codegen_flags: <defaults>
</compile_context>

<pallas_src>
import functools

import jax
import jax.numpy as jnp
from jax.experimental import pallas as pl
from jax.experimental.pallas import tpu as pltpu


def _round_up(x, m):
    return ((x + m - 1) // m) * m


def preprocessor_kernel(x_ref, w1_ref, w2_ref, p_ref, o_ref, *, hidden, eps):
    """Two fused blocks of Linear -> LayerNorm -> ReLU (Dropout = identity)."""
    inv_h = 1.0 / float(hidden)

    p = p_ref[...].astype(jnp.float32)         # (4, H_pad): [b1; b2; gamma; beta]
    b1, b2, gamma, beta = p[0:1, :], p[1:2, :], p[2:3, :], p[3:4, :]

    def ln_relu(h):
        # Padded lanes of h are exactly zero, so unmasked full-lane sums equal
        # the sums over the true `hidden` lanes -> fused single-pass stats.
        s = jnp.sum(h, axis=-1, keepdims=True)
        sq = jnp.sum(h * h, axis=-1, keepdims=True)
        mean = s * inv_h
        var = jnp.maximum(sq * inv_h - mean * mean, 0.0)
        inv = jax.lax.rsqrt(var + eps)
        # Padded gamma/beta lanes are zero -> padded output lanes stay zero.
        return jnp.maximum((h - mean) * inv * gamma + beta, 0.0)

    # ---- block 1: Linear -> LayerNorm -> ReLU -> (Dropout = identity) ----
    h = jnp.dot(x_ref[...], w1_ref[...], preferred_element_type=jnp.float32) + b1
    h = ln_relu(h)

    # ---- block 2: Linear -> LayerNorm (shared gamma/beta) -> ReLU ----------
    h = jnp.dot(h.astype(w2_ref.dtype), w2_ref[...],
                preferred_element_type=jnp.float32) + b2
    h = ln_relu(h)

    o_ref[...] = h.astype(o_ref.dtype)


@functools.partial(jax.jit, static_argnames=("tile_m", "eps"))
def preprocessor_forward(x, w1, b1, w2, b2, gamma, beta, *, tile_m=None, eps=1e-5):
    N, C_in = x.shape
    H = w1.shape[1]

    # --- lane-dense hidden axis: zero-pad H up to a multiple of 128 ---------
    H_pad = _round_up(H, 128)
    params = jnp.concatenate(
        [b1.reshape(1, -1), b2.reshape(1, -1),
         gamma.reshape(1, -1), beta.reshape(1, -1)], axis=0).astype(jnp.float32)
    if H_pad != H:
        dh = H_pad - H
        w1 = jnp.pad(w1, ((0, 0), (0, dh)))
        w2 = jnp.pad(w2, ((0, dh), (0, dh)))
        params = jnp.pad(params, ((0, 0), (0, dh)))

    # --- per-generation VMEM budget -----------------------------------------
    try:
        vmem_cap = int(pltpu.get_tpu_info().vmem_capacity_bytes)
    except Exception:
        vmem_cap = 64 << 20                      # conservative (v7x) fallback
    budget = (vmem_cap * 3) // 4                 # ~48 MiB v7x, ~96 MiB v5e/v6e

    x_item = jnp.dtype(x.dtype).itemsize
    w_item = jnp.dtype(w1.dtype).itemsize
    c_lanes = _round_up(C_in, 128)               # VMEM lane-pads the x tile

    pin_invariants = H_pad >= 512                # single-buffer big weights
    wbuf = 1 if pin_invariants else 2
    weight_bytes = wbuf * ((c_lanes * H_pad + H_pad * H_pad) * w_item
                           + 8 * H_pad * 4)
    # per-row bytes: double-buffered x & out tiles + ~3 f32-tile intermediates
    row_bytes = 2 * c_lanes * x_item + 2 * H_pad * x_item + 3 * H_pad * 4

    if tile_m is None:
        tile_m = (budget - weight_bytes - (2 << 20)) // row_bytes
        tile_m = min(max(tile_m, 8), 4096)
    # Keep >= 2 grid steps so both v7x TensorCores are used (cheap elsewhere).
    half_rows = _round_up(max((N + 1) // 2, 1), 8)
    tile_m = int(max(8, (min(int(tile_m), half_rows) // 8) * 8))

    # --- ragged last tile; pad N only to the 8-row sublane granule if needed -
    N_pad = _round_up(N, 8)
    if N_pad != N:
        x = jnp.pad(x, ((0, N_pad - N), (0, 0)))
    grid = ((N_pad + tile_m - 1) // tile_m,)

    est = weight_bytes + tile_m * row_bytes + (4 << 20)
    vmem_limit = int(min(max(est, 16 << 20), budget))

    if pin_invariants:
        def inv_spec(shape):
            return pl.BlockSpec(shape, lambda i: (0, 0),
                                pipeline_mode=pl.Buffered(1))
    else:
        def inv_spec(shape):
            return pl.BlockSpec(shape, lambda i: (0, 0))

    out = pl.pallas_call(
        functools.partial(preprocessor_kernel, hidden=H, eps=eps),
        out_shape=jax.ShapeDtypeStruct((N_pad, H_pad), x.dtype),
        grid=grid,
        in_specs=[
            pl.BlockSpec((tile_m, C_in), lambda i: (i, 0)),   # x row tile
            inv_spec((C_in, H_pad)),                          # W1 (grid-invariant)
            inv_spec((H_pad, H_pad)),                         # W2 (grid-invariant)
            inv_spec((4, H_pad)),                             # [b1; b2; gamma; beta]
        ],
        out_specs=pl.BlockSpec((tile_m, H_pad), lambda i: (i, 0)),
        compiler_params=pltpu.CompilerParams(
            dimension_semantics=("parallel",),
            vmem_limit_bytes=vmem_limit),
    )(x, w1, w2, params)

    return out[:N, :H]


def reference_forward(x, w1, b1, w2, b2, gamma, beta, eps=1e-5):
    def ln(h):
        mean = jnp.mean(h, axis=-1, keepdims=True)
        var = jnp.mean(jnp.square(h - mean), axis=-1, keepdims=True)
        return (h - mean) * jax.lax.rsqrt(var + eps) * gamma + beta

    h = x.astype(jnp.float32) @ w1.astype(jnp.float32) + b1
    h = jnp.maximum(ln(h), 0.0)
    h = h @ w2.astype(jnp.float32) + b2
    h = jnp.maximum(ln(h), 0.0)
    return h.astype(x.dtype)


if __name__ == "__main__":
    # Small shapes consistent with the module: N nodes, in_channels, hidden.
    N, C_IN, HIDDEN = 128, 32, 32
    key = jax.random.PRNGKey(0)
    k_x, k_w1, k_b1, k_w2, k_b2 = jax.random.split(key, 5)

    x = jax.random.normal(k_x, (N, C_IN), dtype=jnp.float32)

    # Deterministic parameter init (kaiming-uniform-ish scale, like nn.Linear).
    lim1 = 1.0 / (C_IN ** 0.5)
    lim2 = 1.0 / (HIDDEN ** 0.5)
    w1 = jax.random.uniform(k_w1, (C_IN, HIDDEN), jnp.float32, -lim1, lim1)
    b1 = jax.random.uniform(k_b1, (1, HIDDEN), jnp.float32, -lim1, lim1)
    w2 = jax.random.uniform(k_w2, (HIDDEN, HIDDEN), jnp.float32, -lim2, lim2)
    b2 = jax.random.uniform(k_b2, (1, HIDDEN), jnp.float32, -lim2, lim2)
    # Shared LayerNorm params (PyTorch default init: ones / zeros).
    gamma = jnp.ones((1, HIDDEN), jnp.float32)
    beta = jnp.zeros((1, HIDDEN), jnp.float32)

    out = preprocessor_forward(x, w1, b1, w2, b2, gamma, beta)
    out = jax.block_until_ready(out)

    ref = reference_forward(x, w1, b1, w2, b2, gamma, beta)
    assert out.shape == (N, HIDDEN)
    assert jnp.allclose(out, ref, atol=1e-4, rtol=1e-4), "mismatch vs reference"

    print("KERNEL_OK")
</pallas_src>

<mosaic_0001>
module attributes {stable_mosaic.version = 11 : i64} {
  func.func @preprocessor_kernel(%arg0: i32, %arg1: memref<64x32xf32, #tpu.memory_space<vmem>>, %arg2: memref<32x128xf32, #tpu.memory_space<vmem>>, %arg3: memref<128x128xf32, #tpu.memory_space<vmem>>, %arg4: memref<4x128xf32, #tpu.memory_space<vmem>>, %arg5: memref<64x128xf32, #tpu.memory_space<vmem>>) attributes {dimension_semantics = [#tpu.dimension_semantics<parallel>], iteration_bounds = array<i64: 2>, scalar_prefetch = 0 : i64, scratch_operands = 0 : i64, tpu.core_type = #tpu.core_type<tc>, window_params = [{transform_indices = @transform_0, window_bounds = array<i64: 64, 32>}, {pipeline_mode = #tpu.pipeline_mode<synchronous>, transform_indices = @transform_1, window_bounds = array<i64: 32, 128>}, {pipeline_mode = #tpu.pipeline_mode<synchronous>, transform_indices = @transform_2, window_bounds = array<i64: 128, 128>}, {pipeline_mode = #tpu.pipeline_mode<synchronous>, transform_indices = @transform_3, window_bounds = array<i64: 4, 128>}, {transform_indices = @transform_4, window_bounds = array<i64: 64, 128>}]} {
    %c0 = arith.constant 0 : index
    %c0_0 = arith.constant 0 : index
    %0 = vector.load %arg4[%c0, %c0_0] : memref<4x128xf32, #tpu.memory_space<vmem>>, vector<4x128xf32>
    %1 = vector.extract_strided_slice %0 {offsets = [0, 0], sizes = [1, 128], strides = [1, 1]} : vector<4x128xf32> to vector<1x128xf32>
    %2 = vector.extract_strided_slice %0 {offsets = [1, 0], sizes = [1, 128], strides = [1, 1]} : vector<4x128xf32> to vector<1x128xf32>
    %3 = vector.extract_strided_slice %0 {offsets = [2, 0], sizes = [1, 128], strides = [1, 1]} : vector<4x128xf32> to vector<1x128xf32>
    %4 = vector.extract_strided_slice %0 {offsets = [3, 0], sizes = [1, 128], strides = [1, 1]} : vector<4x128xf32> to vector<1x128xf32>
    %c0_1 = arith.constant 0 : index
    %c0_2 = arith.constant 0 : index
    %5 = vector.load %arg1[%c0_1, %c0_2] : memref<64x32xf32, #tpu.memory_space<vmem>>, vector<64x32xf32>
    %c0_3 = arith.constant 0 : index
    %c0_4 = arith.constant 0 : index
    %6 = vector.load %arg2[%c0_3, %c0_4] : memref<32x128xf32, #tpu.memory_space<vmem>>, vector<32x128xf32>
    %cst = arith.constant dense<0.000000e+00> : vector<64x128xf32>
    %7 = tpu.matmul %5, %6, %cst {dimension_numbers = #tpu.dot_dimension_numbers<[1], [0], [0], [1], [0, 0, 1, 1], [], []>} : vector<64x32xf32>, vector<32x128xf32>, vector<64x128xf32> -> vector<64x128xf32>
    %8 = vector.broadcast %1 : vector<1x128xf32> to vector<64x128xf32>
    %9 = arith.addf %7, %8 : vector<64x128xf32>
    %cst_5 = arith.constant dense<0.000000e+00> : vector<64xf32>
    %10 = vector.multi_reduction <add>, %9, %cst_5 [1] : vector<64x128xf32> to vector<64xf32>
    %11 = vector.shape_cast %10 : vector<64xf32> to vector<64x1xf32>
    %12 = arith.mulf %9, %9 : vector<64x128xf32>
    %cst_6 = arith.constant dense<0.000000e+00> : vector<64xf32>
    %13 = vector.multi_reduction <add>, %12, %cst_6 [1] : vector<64x128xf32> to vector<64xf32>
    %14 = vector.shape_cast %13 : vector<64xf32> to vector<64x1xf32>
    %cst_7 = arith.constant 3.125000e-02 : f32
    %15 = vector.broadcast %cst_7 : f32 to vector<64x1xf32>
    %16 = arith.mulf %11, %15 : vector<64x1xf32>
    %cst_8 = arith.constant 3.125000e-02 : f32
    %17 = vector.broadcast %cst_8 : f32 to vector<64x1xf32>
    %18 = arith.mulf %14, %17 : vector<64x1xf32>
    %19 = arith.mulf %16, %16 : vector<64x1xf32>
    %20 = arith.subf %18, %19 : vector<64x1xf32>
    %cst_9 = arith.constant 0.000000e+00 : f32
    %21 = vector.broadcast %cst_9 : f32 to vector<64x1xf32>
    %22 = arith.maximumf %20, %21 : vector<64x1xf32>
    %cst_10 = arith.constant 9.99999974E-6 : f32
    %23 = vector.broadcast %cst_10 : f32 to vector<64x1xf32>
    %24 = arith.addf %22, %23 : vector<64x1xf32>
    %25 = math.rsqrt %24 : vector<64x1xf32>
    %26 = vector.broadcast %16 : vector<64x1xf32> to vector<64x128xf32>
    %27 = arith.subf %9, %26 : vector<64x128xf32>
    %28 = vector.broadcast %25 : vector<64x1xf32> to vector<64x128xf32>
    %29 = arith.mulf %27, %28 : vector<64x128xf32>
    %30 = vector.broadcast %3 : vector<1x128xf32> to vector<64x128xf32>
    %31 = arith.mulf %29, %30 : vector<64x128xf32>
    %32 = vector.broadcast %4 : vector<1x128xf32> to vector<64x128xf32>
    %33 = arith.addf %31, %32 : vector<64x128xf32>
    %cst_11 = arith.constant 0.000000e+00 : f32
    %34 = vector.broadcast %cst_11 : f32 to vector<64x128xf32>
    %35 = arith.maximumf %33, %34 : vector<64x128xf32>
    %c0_12 = arith.constant 0 : index
    %c0_13 = arith.constant 0 : index
    %36 = vector.load %arg3[%c0_12, %c0_13] : memref<128x128xf32, #tpu.memory_space<vmem>>, vector<128x128xf32>
    %cst_14 = arith.constant dense<0.000000e+00> : vector<64x128xf32>
    %37 = tpu.matmul %35, %36, %cst_14 {dimension_numbers = #tpu.dot_dimension_numbers<[1], [0], [0], [1], [0, 0, 1, 1], [], []>} : vector<64x128xf32>, vector<128x128xf32>, vector<64x128xf32> -> vector<64x128xf32>
    %38 = vector.broadcast %2 : vector<1x128xf32> to vector<64x128xf32>
    %39 = arith.addf %37, %38 : vector<64x128xf32>
    %cst_15 = arith.constant dense<0.000000e+00> : vector<64xf32>
    %40 = vector.multi_reduction <add>, %39, %cst_15 [1] : vector<64x128xf32> to vector<64xf32>
    %41 = vector.shape_cast %40 : vector<64xf32> to vector<64x1xf32>
    %42 = arith.mulf %39, %39 : vector<64x128xf32>
    %cst_16 = arith.constant dense<0.000000e+00> : vector<64xf32>
    %43 = vector.multi_reduction <add>, %42, %cst_16 [1] : vector<64x128xf32> to vector<64xf32>
    %44 = vector.shape_cast %43 : vector<64xf32> to vector<64x1xf32>
    %cst_17 = arith.constant 3.125000e-02 : f32
    %45 = vector.broadcast %cst_17 : f32 to vector<64x1xf32>
    %46 = arith.mulf %41, %45 : vector<64x1xf32>
    %cst_18 = arith.constant 3.125000e-02 : f32
    %47 = vector.broadcast %cst_18 : f32 to vector<64x1xf32>
    %48 = arith.mulf %44, %47 : vector<64x1xf32>
    %49 = arith.mulf %46, %46 : vector<64x1xf32>
    %50 = arith.subf %48, %49 : vector<64x1xf32>
    %cst_19 = arith.constant 0.000000e+00 : f32
    %51 = vector.broadcast %cst_19 : f32 to vector<64x1xf32>
    %52 = arith.maximumf %50, %51 : vector<64x1xf32>
    %cst_20 = arith.constant 9.99999974E-6 : f32
    %53 = vector.broadcast %cst_20 : f32 to vector<64x1xf32>
    %54 = arith.addf %52, %53 : vector<64x1xf32>
    %55 = math.rsqrt %54 : vector<64x1xf32>
    %56 = vector.broadcast %46 : vector<64x1xf32> to vector<64x128xf32>
    %57 = arith.subf %39, %56 : vector<64x128xf32>
    %58 = vector.broadcast %55 : vector<64x1xf32> to vector<64x128xf32>
    %59 = arith.mulf %57, %58 : vector<64x128xf32>
    %60 = vector.broadcast %3 : vector<1x128xf32> to vector<64x128xf32>
    %61 = arith.mulf %59, %60 : vector<64x128xf32>
    %62 = vector.broadcast %4 : vector<1x128xf32> to vector<64x128xf32>
    %63 = arith.addf %61, %62 : vector<64x128xf32>
    %cst_21 = arith.constant 0.000000e+00 : f32
    %64 = vector.broadcast %cst_21 : f32 to vector<64x128xf32>
    %65 = arith.maximumf %63, %64 : vector<64x128xf32>
    %c0_22 = arith.constant 0 : index
    %c0_23 = arith.constant 0 : index
    %66 = vector.load %arg5[%c0_22, %c0_23] : memref<64x128xf32, #tpu.memory_space<vmem>>, vector<64x128xf32>
    tpu.vector_store %arg5[%c0_22, %c0_23], %65 {strides = array<i32>} : memref<64x128xf32, #tpu.memory_space<vmem>>, vector<64x128xf32>,
    return
  }
  func.func @transform_0(%arg0: i32) -> (i32, i32) {
    %c0_i32 = arith.constant 0 : i32
    %c0_i32_0 = arith.constant 0 : i32
    return %arg0, %c0_i32 : i32, i32
  }
  func.func @transform_1(%arg0: i32) -> (i32, i32) {
    %c0_i32 = arith.constant 0 : i32
    %c0_i32_0 = arith.constant 0 : i32
    %c0_i32_1 = arith.constant 0 : i32
    return %c0_i32, %c0_i32_0 : i32, i32
  }
  func.func @transform_2(%arg0: i32) -> (i32, i32) {
    %c0_i32 = arith.constant 0 : i32
    %c0_i32_0 = arith.constant 0 : i32
    %c0_i32_1 = arith.constant 0 : i32
    return %c0_i32, %c0_i32_0 : i32, i32
  }
  func.func @transform_3(%arg0: i32) -> (i32, i32) {
    %c0_i32 = arith.constant 0 : i32
    %c0_i32_0 = arith.constant 0 : i32
    %c0_i32_1 = arith.constant 0 : i32
    return %c0_i32, %c0_i32_0 : i32, i32
  }
  func.func @transform_4(%arg0: i32) -> (i32, i32) {
    %c0_i32 = arith.constant 0 : i32
    %c0_i32_0 = arith.constant 0 : i32
    return %arg0, %c0_i32 : i32, i32
  }
}

</mosaic_0001>

<bundles_post_ra>
// kernel: preprocessor_forward.1
= control target key start
LH: loop header
LB: loop body
LE: loop exit
PB: predicated region body
PF: predicated region fallthrough
CT: control target
= control target key end

     0   :  { %s1065_s15 = smov 0   ;;  %s1374_s0 = inlined_call_operand.vmem [shape: f32[128,32], index: 0, kind: input, shape index: {}]   ;;  %s1375_s1 = inlined_call_operand.vmem [shape: f32[32,128], index: 1, kind: input, shape index: {}]   ;;  %s1376_s2 = inlined_call_operand.vmem [shape: f32[128,128], index: 2, kind: input, shape index: {}]   ;;  %s1377_s3 = inlined_call_operand.vmem [shape: f32[4,128], index: 3, kind: input, shape index: {}]   ;;  %s1378_s4 = inlined_call_operand.vmem [shape: f32[128,128], index: 4, kind: output, shape index: {}]  }
   0x1 LB: > { %s817_s16 = sadd.s32 4294967295, %s1038_s15   ;;  %p821_p0 = scmp.ge.s32.totalorder %s1038_s15, 1  ;;  %s1038_s15 = sphi %s1065_s15, %s14_s15  }
   0x2   : > { %p163_p1 = scmp.lt.s32.totalorder %s1038_s15, 3 }
   0x4   : > { %p164_p2 = pnand %p821_p0, %p163_p1 }
   0x5   : > { %v210_v0 = vld [vmem:[%s1375_s1] sm:$0xff] (!%p164_p2)  ;;  %v211_v1 = vld [vmem:[%s1375_s1 + $0x8] sm:$0xff] (!%p164_p2)  ;;  %v212_v2 = vld [vmem:[%s1375_s1 + $0x10] sm:$0xff] (!%p164_p2)  ;;  %s822_s23 = sshll.u32 (!%p164_p2), %s817_s16, 3  ;;  %vm218_vm0 = vcmask (!%p164_p2), 261120   ;;  %v214_v14 = vlaneseq (!%p164_p2) }
   0x6   : > { %167 = sbr.rel (%p164_p2) target bundleno = 842 (0x34a), region = 36  ;;  %v936_v3 = vpack.c.bf16 (!%p164_p2), %v211_v1, %v210_v0  ;;  %v213_v4 = vld [vmem:[%s1375_s1 + $0x18] sm:$0xff] (!%p164_p2)  ;;  %p190_p3 = scmp.lt.s32.totalorder (!%p164_p2), %s822_s23, 15  ;;  %v1107_v17 = vld [vmem:[%s1377_s3] sm:$0xf] (!%p164_p2)  ;;  %v493_v39 = vld [vmem:[%s1376_s2 + $0x8] sm:$0xff] (!%p164_p2) }
   0x7   : > { %v940_v5 = vpack.c.bf16 (!%p164_p2), %v213_v4, %v212_v2  ;;  %v1101_v15 = vshrl.u32 (!%p164_p2), %v214_v14, 7  ;;  %v492_v38 = vld [vmem:[%s1376_s2] sm:$0xff] (!%p164_p2)  ;;  %v494_v43 = vld [vmem:[%s1376_s2 + $0x10] sm:$0xff] (!%p164_p2)  ;;  %v495_v44 = vld [vmem:[%s1376_s2 + $0x18] sm:$0xff] (!%p164_p2) }
   0x8   : > { %937 = vmatprep.subr.bf16.mxu0 (!%p164_p2), %v936_v3  ;;  %v944_v42 = vpack.c.bf16 (!%p164_p2), %v493_v39, %v492_v38  ;;  %v948_v47 = vpack.c.bf16 (!%p164_p2), %v495_v44, %v494_v43  ;;  %v496_v49 = vld [vmem:[%s1376_s2 + $0x20] sm:$0xff] (!%p164_p2)  ;;  %v497_v50 = vld [vmem:[%s1376_s2 + $0x28] sm:$0xff] (!%p164_p2)  ;;  %v498_v52 = vld [vmem:[%s1376_s2 + $0x30] sm:$0xff] (!%p164_p2) }
   0x9   : > { %939 = vmatpush3.bf16.msra.mxu0 (!%p164_p2), %v936_v3  ;;  %v216_v16 = vsub.s32 (!%p164_p2), 0, %v1101_v15  ;;  %v952_v51 = vpack.c.bf16 (!%p164_p2), %v497_v50, %v496_v49  ;;  %v499_v53 = vld [vmem:[%s1376_s2 + $0x38] sm:$0xff] (!%p164_p2)  ;;  %v500_v55 = vld [vmem:[%s1376_s2 + $0x40] sm:$0xff] (!%p164_p2)  ;;  %v501_v56 = vld [vmem:[%s1376_s2 + $0x48] sm:$0xff] (!%p164_p2) }
   0xa   : > { %941 = vmatprep.subr.bf16.mxu0 (!%p164_p2), %v940_v5  ;;  %976 = vmatprep.subr.bf16.mxu1 (!%p164_p2), %v944_v42  ;;  %v956_v54 = vpack.c.bf16 (!%p164_p2), %v499_v53, %v498_v52  ;;  %v960_v57 = vpack.c.bf16 (!%p164_p2), %v501_v56, %v500_v55  ;;  %v502_v58 = vld [vmem:[%s1376_s2 + $0x50] sm:$0xff] (!%p164_p2)  ;;  %v503_v59 = vld [vmem:[%s1376_s2 + $0x58] sm:$0xff] (!%p164_p2)  ;;  %v504_v61 = vld [vmem:[%s1376_s2 + $0x60] sm:$0xff] (!%p164_p2) }
   0xb   : > { %v217_v18 = vrot.slane (!%p164_p2), %v1107_v17, %v216_v16  ;;  %984 = vmatpush3.bf16.msra.mxu1 (!%p164_p2), %v944_v42  ;;  %v964_v60 = vpack.c.bf16 (!%p164_p2), %v503_v59, %v502_v58  ;;  %v505_v62 = vld [vmem:[%s1376_s2 + $0x68] sm:$0xff] (!%p164_p2)  ;;  %v506_v0 = vld [vmem:[%s1376_s2 + $0x70] sm:$0xff] (!%p164_p2)  ;;  %v507_v1 = vld [vmem:[%s1376_s2 + $0x78] sm:$0xff] (!%p164_p2) }
   0xc   : > { %977 = vmatprep.subr.bf16.mxu1 (!%p164_p2), %v948_v47  ;;  %v968_v63 = vpack.c.bf16 (!%p164_p2), %v505_v62, %v504_v61  ;;  %v972_v2 = vpack.c.bf16 (!%p164_p2), %v507_v1, %v506_v0 }
   0xd   : > { %s1380_s23 = smov (!%p190_p3, %s822_s23), 15  ;;  %943 = vmatpush3.bf16.msra.mxu0 %v940_v5 }
   0xe   : > { %s823_s26 = sshll.u32 %s1380_s23, 3  ;;  %945 = vmatprep.subr.bf16.mxu0 %v944_v42 }
   0xf   : > { %s193_s29 = scalar_lea.vmem %s1374_s0, %s823_s26  ;;  %985 = vmatpush3.bf16.msra.mxu1 %v948_v47  ;;  %s1337_s18 = scalar_lea.vmem %s1378_s4, %s823_s26 }
  0x10   : > { %v202_v6 = vld [vmem:[%s193_s29] sm:$0xff]  ;;  %v203_v7 = vld [vmem:[%s193_s29 + $0x8] sm:$0xff]  ;;  %v204_v8 = vld [vmem:[%s193_s29 + $0x10] sm:$0xff]  ;;  %978 = vmatprep.subr.bf16.mxu1 %v952_v51 }
  0x11   : > { %880 = vmatprep.mubr.msk.f32.mxu0 %vm218_vm0, %v202_v6  ;;  %v205_v9 = vld [vmem:[%s193_s29 + $0x18] sm:$0xff]  ;;  %v206_v10 = vld [vmem:[%s193_s29 + $0x20] sm:$0xff]  ;;  %v207_v11 = vld [vmem:[%s193_s29 + $0x28] sm:$0xff] }
  0x12   : > { %881 = vmatmul.mubr.msk.f32.vlgmr.msra.gmra.mrb[0].mxu0 %vm218_vm0, %v203_v7  ;;  %v208_v12 = vld [vmem:[%s193_s29 + $0x30] sm:$0xff]  ;;  %v209_v13 = vld [vmem:[%s193_s29 + $0x38] sm:$0xff] }
  0x13   : > { %883 = vmatprep.mubr.msk.f32.mxu0 %vm218_vm0, %v204_v8  ;;  %947 = vmatpush3.bf16.msra.mxu0 %v944_v42 }
  0x14   : > { %949 = vmatprep.subr.bf16.mxu0 %v948_v47  ;;  %986 = vmatpush3.bf16.msra.mxu1 %v952_v51 }
  0x15   : > { %979 = vmatprep.subr.bf16.mxu1 %v956_v54 }
  0x16   : > { %884 = vmatmul.mubr.msk.f32.gmra.mrb[2].mxu0 %vm218_vm0, %v205_v9 }
  0x17   : > { %886 = vmatprep.mubr.msk.f32.mxu0 %vm218_vm0, %v206_v10  ;;  %951 = vmatpush3.bf16.msra.mxu0 %v948_v47 }
  0x18   : > { %953 = vmatprep.subr.bf16.mxu0 %v952_v51  ;;  %987 = vmatpush3.bf16.msra.mxu1 %v956_v54 }
  0x19   : > { %980 = vmatprep.subr.bf16.mxu1 %v960_v57 }
  0x1a   : > { %887 = vmatmul.mubr.msk.f32.gmra.mrb[4].mxu0 %vm218_vm0, %v207_v11 }
  0x1b   : > { %889 = vmatprep.mubr.msk.f32.mxu0 %vm218_vm0, %v208_v12  ;;  %955 = vmatpush3.bf16.msra.mxu0 %v952_v51 }
  0x1c   : > { %957 = vmatprep.subr.bf16.mxu0 %v956_v54  ;;  %988 = vmatpush3.bf16.msra.mxu1 %v960_v57 }
  0x1d   : > { %981 = vmatprep.subr.bf16.mxu1 %v964_v60 }
  0x1e   : > { %890 = vmatmul.mubr.msk.f32.gmra.mrb[6].mxu0 %vm218_vm0, %v209_v13 }
  0x1f   : > { %959 = vmatpush3.bf16.msra.mxu0 %v956_v54 }
  0x20   : > { %961 = vmatprep.subr.bf16.mxu0 %v960_v57  ;;  %989 = vmatpush3.bf16.msra.mxu1 %v964_v60 }
  0x21   : > { %982 = vmatprep.subr.bf16.mxu1 %v968_v63 }
  0x23   : > { %963 = vmatpush3.bf16.msra.mxu0 %v960_v57  ;;  %v474_v57 = vsub.s32 3, %v1101_v15 }
  0x24   : > { %965 = vmatprep.subr.bf16.mxu0 %v964_v60  ;;  %990 = vmatpush3.bf16.msra.mxu1 %v968_v63 }
  0x25   : > { %983 = vmatprep.subr.bf16.mxu1 %v972_v2 }
  0x27   : > { %967 = vmatpush3.bf16.msra.mxu0 %v964_v60 }
  0x28   : > { %969 = vmatprep.subr.bf16.mxu0 %v968_v63  ;;  %991 = vmatpush3.bf16.msra.mxu1 %v972_v2 }
  0x2b   : > { %971 = vmatpush3.bf16.msra.mxu0 %v968_v63 }
  0x2c   : > { %973 = vmatprep.subr.bf16.mxu0 %v972_v2 }
  0x2f   : > { %975 = vmatpush3.bf16.msra.mxu0 %v972_v2 }
  0xe5   : > { %v882_v19 = vpop.f32.mrb[0].mxu0 }
  0xe6   : > { %v1110_v20 = vadd.f32 %v882_v19, %v217_v18  ;;  %v309_v21 = vpop.f32.mrb[1].mxu0 }
  0xe7   : > { %v1113_v23 = vadd.f32 %v309_v21, %v217_v18 }
  0xe8   : > { %350 = vadd.xlane.f32.xlu0 %v1110_v20  ;;  %v365_v45 = vmul.f32 %v1110_v20, %v1110_v20 }
  0xe9   : > { %v885_v22 = vpop.f32.mrb[2].mxu0  ;;  %v364_v41 = vmul.f32 %v1113_v23, %v1113_v23 }
  0xea   : > { %v1115_v24 = vadd.f32 %v885_v22, %v217_v18  ;;  %v319_v25 = vpop.f32.mrb[3].mxu0 }
  0xeb   : > { %v1117_v26 = vadd.f32 %v319_v25, %v217_v18 }
  0xec   : > { %348 = vadd.xlane.f32.xlu0 %v1113_v23  ;;  %v367_v27 = vmul.f32 %v1115_v24, %v1115_v24 }
  0xed   : > { %v888_v28 = vpop.f32.mrb[4].mxu0  ;;  %v366_v29 = vmul.f32 %v1117_v26, %v1117_v26 }
  0xee   : > { %378 = vadd.xlane.f32.xlu1 %v367_v27  ;;  %v329_v30 = vpop.f32.mrb[5].mxu0  ;;  %v1125_v32 = vadd.f32 %v888_v28, %v217_v18 }
  0xef   : > { %v1127_v34 = vadd.f32 %v329_v30, %v217_v18 }
  0xf0   : > { %354 = vadd.xlane.f32.xlu0 %v1115_v24  ;;  %v369_v35 = vmul.f32 %v1125_v32, %v1125_v32 }
  0xf1   : > { %v891_v31 = vpop.f32.mrb[6].mxu0  ;;  %v368_v37 = vmul.f32 %v1127_v34, %v1127_v34 }
  0xf2   : > { %376 = vadd.xlane.f32.xlu1 %v366_v29  ;;  %v339_v33 = vpop.f32.mrb[7].mxu0  ;;  %v1134_v36 = vadd.f32 %v891_v31, %v217_v18 }
  0xf3   : > { %v1145_v40 = vadd.f32 %v339_v33, %v217_v18 }
  0xf4   : > { %352 = vadd.xlane.f32.xlu0 %v1117_v26  ;;  %v371_v48 = vmul.f32 %v1134_v36, %v1134_v36 }
  0xf5   : > { %v370_v46 = vmul.f32 %v1145_v40, %v1145_v40 }
  0xf6   : > { %358 = vadd.xlane.f32.xlu1 %v1125_v32 }
  0xf8   : > { %356 = vadd.xlane.f32.xlu0 %v1127_v34 }
  0xfa   : > { %382 = vadd.xlane.f32.xlu1 %v369_v35 }
  0xfc   : > { %380 = vadd.xlane.f32.xlu0 %v368_v37 }
  0xfe   : > { %362 = vadd.xlane.f32.xlu1 %v1134_v36 }
 0x100   : > { %372 = vadd.xlane.f32.xlu0 %v364_v41 }
 0x102   : > { %360 = vadd.xlane.f32.xlu1 %v1145_v40 }
 0x104   : > { %374 = vadd.xlane.f32.xlu0 %v365_v45 }
 0x106   : > { %384 = vadd.xlane.f32.xlu1 %v370_v46  ;;  %v462_v46 = vsub.s32 2, %v1101_v15 }
 0x108   : > { %v1220_v56 = vrot.slane %v1107_v17, %v462_v46 }
 0x10a   : > { %386 = vadd.xlane.f32.xlu1 %v371_v48 }
 0x175   : > { %v351_v3 = vpop.xlane.xlu0 %350 }
 0x176   : > { %v1213_v48 = vmul.f32 0.03125, %v351_v3 }
 0x178   : > { %v405_v62 = vmul.f32 %v1213_v48, %v1213_v48 }
 0x179   : > { %v349_v4 = vpop.xlane.xlu0 %348 }
 0x17a   : > { %v1210_v42 = vmul.f32 0.03125, %v349_v4 }
 0x17b   : > { %v379_v5 = vpop.xlane.xlu1 %378 }
 0x17c   : > { %v399_v7 = vmul.f32 0.03125, %v379_v5  ;;  %v404_v51 = vmul.f32 %v1210_v42, %v1210_v42  ;;  %v444_v46 = vsub.f32 %v1113_v23, %v1210_v42 }
 0x17d   : > { %v355_v6 = vpop.xlane.xlu0 %354 }
 0x17e   : > { %v391_v8 = vmul.f32 0.03125, %v355_v6 }
 0x17f   : > { %v377_v9 = vpop.xlane.xlu1 %376 }
 0x180   : > { %v407_v10 = vmul.f32 %v391_v8, %v391_v8  ;;  %v398_v18 = vmul.f32 0.03125, %v377_v9  ;;  %v447_v58 = vsub.f32 %v1115_v24, %v391_v8  ;;  %v1231_v24 = vrot.slane %v1107_v17, %v474_v57 }
 0x181   : > { %v353_v11 = vpop.xlane.xlu0 %352 }
 0x182   : > { %v415_v12 = vsub.f32 %v399_v7, %v407_v10  ;;  %v1198_v13 = vmul.f32 0.03125, %v353_v11 }
 0x183   : > { %v359_v14 = vpop.xlane.xlu1 %358 }
 0x184   : > { %v423_v16 = vmax.f32 %v415_v12, 0.0  ;;  %v406_v19 = vmul.f32 %v1198_v13, %v1198_v13  ;;  %v1202_v21 = vmul.f32 0.03125, %v359_v14  ;;  %v446_v7 = vsub.f32 %v1117_v26, %v1198_v13 }
 0x185   : > { %v357_v22 = vpop.xlane.xlu0 %356 }
 0x186   : > { %v431_v25 = vadd.f32 1e-05, %v423_v16  ;;  %v414_v27 = vsub.f32 %v398_v18, %v406_v19  ;;  %v409_v28 = vmul.f32 %v1202_v21, %v1202_v21  ;;  %v1206_v29 = vmul.f32 0.03125, %v357_v22 }
 0x187   : > { %v383_v30 = vpop.xlane.xlu1 %382 }
 0x188   : > { %1000 = vrsqrt.f32 %v431_v25  ;;  %v422_v31 = vmax.f32 %v414_v27, 0.0  ;;  %v401_v33 = vmul.f32 0.03125, %v383_v30  ;;  %v408_v38 = vmul.f32 %v1206_v29, %v1206_v29 }
 0x189   : > { %v381_v35 = vpop.xlane.xlu0 %380  ;;  %v449_v27 = vsub.f32 %v1125_v32, %v1202_v21 }
 0x18a   : > { %v430_v37 = vadd.f32 1e-05, %v422_v31  ;;  %v417_v39 = vsub.f32 %v401_v33, %v409_v28  ;;  %v400_v41 = vmul.f32 0.03125, %v381_v35  ;;  %v448_v33 = vsub.f32 %v1127_v34, %v1206_v29 }
 0x18b   : > { %v363_v43 = vpop.xlane.xlu1 %362 }
 0x18c   : > { %1002 = vrsqrt.f32 %v430_v37  ;;  %v425_v44 = vmax.f32 %v417_v39, 0.0  ;;  %v416_v45 = vsub.f32 %v400_v41, %v408_v38  ;;  %v1228_v4 = vmul.f32 0.03125, %v363_v43 }
 0x18d   : > { %v373_v47 = vpop.xlane.xlu0 %372 }
 0x18e   : > { %v433_v49 = vadd.f32 1e-05, %v425_v44  ;;  %v424_v50 = vmax.f32 %v416_v45, 0.0  ;;  %v396_v52 = vmul.f32 0.03125, %v373_v47  ;;  %v411_v10 = vmul.f32 %v1228_v4, %v1228_v4 }
 0x18f   : > { %v361_v53 = vpop.xlane.xlu1 %360 }
 0x190   : > { %1004 = vrsqrt.f32 %v433_v49  ;;  %v432_v54 = vadd.f32 1e-05, %v424_v50  ;;  %v1217_v55 = vmul.f32 0.03125, %v361_v53  ;;  %v412_v59 = vsub.f32 %v396_v52, %v404_v51 }
 0x191   : > { %v375_v60 = vpop.xlane.xlu0 %374  ;;  %v445_v50 = vsub.f32 %v1110_v20, %v1213_v48  ;;  %v451_v20 = vsub.f32 %v1134_v36, %v1228_v4 }
 0x192   : > { %v1001_v61 = vpop.eup %1000  ;;  %1006 = vrsqrt.f32 %v432_v54  ;;  %v410_v63 = vmul.f32 %v1217_v55, %v1217_v55  ;;  %v397_v0 = vmul.f32 0.03125, %v375_v60  ;;  %v420_v2 = vmax.f32 %v412_v59, 0.0 }
 0x193   : > { %v455_v1 = vmul.f32 %v1001_v61, %v447_v58  ;;  %v385_v3 = vpop.xlane.xlu1 %384  ;;  %v450_v57 = vsub.f32 %v1145_v40, %v1217_v55 }
 0x194   : > { %v413_v5 = vsub.f32 %v397_v0, %v405_v62  ;;  %v402_v6 = vmul.f32 0.03125, %v385_v3  ;;  %v428_v8 = vadd.f32 1e-05, %v420_v2 }
 0x195   : > { %v467_v14 = vmul.f32 %v1220_v56, %v455_v1 }
 0x196   : > { %v1003_v9 = vpop.eup %1002  ;;  %v421_v11 = vmax.f32 %v413_v5, 0.0  ;;  %v418_v12 = vsub.f32 %v402_v6, %v410_v63  ;;  %1008 = vrsqrt.f32 %v428_v8  ;;  %v510_v8 = vsub.s32 1, %v1101_v15 }
 0x197   : > { %v387_v16 = vpop.xlane.xlu1 %386  ;;  %v454_v18 = vmul.f32 %v1003_v9, %v446_v7  ;;  %v479_v31 = vadd.f32 %v1231_v24, %v467_v14 }
 0x198   : > { %v429_v19 = vadd.f32 1e-05, %v421_v11  ;;  %v426_v22 = vmax.f32 %v418_v12, 0.0  ;;  %v403_v25 = vmul.f32 0.03125, %v387_v16  ;;  %v511_v9 = vrot.slane %v1107_v17, %v510_v8 }
 0x199   : > { %v466_v26 = vmul.f32 %v1220_v56, %v454_v18  ;;  %v487_v44 = vmax.f32 %v479_v31, 0.0 }
 0x19a   : > { %v1005_v13 = vpop.eup %1004  ;;  %1010 = vrsqrt.f32 %v429_v19  ;;  %v434_v28 = vadd.f32 1e-05, %v426_v22  ;;  %v419_v30 = vsub.f32 %v403_v25, %v411_v10 }
 0x19b   : > { %v478_v35 = vadd.f32 %v1231_v24, %v466_v26  ;;  %v457_v37 = vmul.f32 %v1005_v13, %v449_v27 }
 0x19c   : > { %v1007_v38 = vpop.eup %1006  ;;  %1012 = vrsqrt.f32 %v434_v28  ;;  %v427_v39 = vmax.f32 %v419_v30, 0.0 }
 0x19d   : > { %v486_v41 = vmax.f32 %v478_v35, 0.0  ;;  %v456_v43 = vmul.f32 %v1007_v38, %v448_v33  ;;  %v469_v32 = vmul.f32 %v1220_v56, %v457_v37 }
 0x19e   : > { %v435_v21 = vadd.f32 1e-05, %v427_v39 }
 0x19f   : > { %927 = vmatprep.mubr.f32.mxu1 %v486_v41  ;;  %v468_v45 = vmul.f32 %v1220_v56, %v456_v43  ;;  %v481_v34 = vadd.f32 %v1231_v24, %v469_v32 }
 0x1a0   : > { %1014 = vrsqrt.f32 %v435_v21  ;;  %928 = vmatmul.mubr.f32.vlgmr.msra.gmra.mrb[0].mxu1 %v487_v44  ;;  %v1009_v29 = vpop.eup %1008 }
 0x1a1   : > { %v480_v47 = vadd.f32 %v1231_v24, %v468_v45  ;;  %v452_v49 = vmul.f32 %v1009_v29, %v444_v46  ;;  %v489_v53 = vmax.f32 %v481_v34, 0.0 }
 0x1a3   : > { %v488_v51 = vmax.f32 %v480_v47, 0.0  ;;  %v464_v54 = vmul.f32 %v1220_v56, %v452_v49 }
 0x1a4   : > { %v1011_v52 = vpop.eup %1010 }
 0x1a5   : > { %v453_v23 = vmul.f32 %v1011_v52, %v445_v50  ;;  %930 = vmatprep.mubr.f32.mxu1 %v488_v51  ;;  %v476_v58 = vadd.f32 %v1231_v24, %v464_v54 }
 0x1a6   : > { %v1013_v42 = vpop.eup %1012  ;;  %931 = vmatmul.mubr.f32.gmra.mrb[2].mxu1 %v489_v53 }
 0x1a7   : > { %v465_v59 = vmul.f32 %v1220_v56, %v453_v23  ;;  %v458_v60 = vmul.f32 %v1013_v42, %v450_v57  ;;  %v484_v61 = vmax.f32 %v476_v58, 0.0 }
 0x1a9   : > { %v477_v48 = vadd.f32 %v1231_v24, %v465_v59  ;;  %v470_v62 = vmul.f32 %v1220_v56, %v458_v60  ;;  %924 = vmatprep.mubr.f32.mxu0 %v484_v61 }
 0x1aa   : > { %v1015_v63 = vpop.eup %1014 }
 0x1ab   : > { %v485_v40 = vmax.f32 %v477_v48, 0.0  ;;  %v482_v55 = vadd.f32 %v1231_v24, %v470_v62  ;;  %v459_v0 = vmul.f32 %v1015_v63, %v451_v20 }
 0x1ad   : > { %925 = vmatmul.mubr.f32.vlgmr.msra.gmra.mrb[8].mxu0 %v485_v40  ;;  %v490_v1 = vmax.f32 %v482_v55, 0.0  ;;  %v471_v2 = vmul.f32 %v1220_v56, %v459_v0 }
 0x1af   : > { %933 = vmatprep.mubr.f32.mxu1 %v490_v1  ;;  %v483_v3 = vadd.f32 %v1231_v24, %v471_v2 }
 0x1b1   : > { %v491_v5 = vmax.f32 %v483_v3, 0.0 }
 0x1b3   : > { %934 = vmatmul.mubr.f32.gmra.mrb[4].mxu1 %v491_v5 }
 0x273   : > { %v929_v36 = vpop.f32.mrb[0].mxu1 }
 0x274   : > { %v588_v4 = vpop.f32.mrb[1].mxu1  ;;  %v1277_v17 = vadd.f32 %v929_v36, %v511_v9 }
 0x275   : > { %v1279_v22 = vadd.f32 %v588_v4, %v511_v9 }
 0x276   : > { %v636_v25 = vmul.f32 %v1277_v17, %v1277_v17 }
 0x277   : > { %v635_v27 = vmul.f32 %v1279_v22, %v1279_v22 }
 0x279   : > { %v932_v6 = vpop.f32.mrb[2].mxu1 }
 0x27a   : > { %v598_v7 = vpop.f32.mrb[3].mxu1  ;;  %v1287_v26 = vadd.f32 %v932_v6, %v511_v9 }
 0x27b   : > { %v1289_v13 = vadd.f32 %v598_v7, %v511_v9 }
 0x27c   : > { %v638_v28 = vmul.f32 %v1287_v26, %v1287_v26 }
 0x27d   : > { %v637_v30 = vmul.f32 %v1289_v13, %v1289_v13 }
 0x280   : > { %v926_v10 = vpop.f32.mrb[8].mxu0 }
 0x281   : > { %v1267_v11 = vadd.f32 %v926_v10, %v511_v9  ;;  %v578_v12 = vpop.f32.mrb[9].mxu0 }
 0x282   : > { %v1269_v14 = vadd.f32 %v578_v12, %v511_v9 }
 0x283   : > { %619 = vadd.xlane.f32.xlu1 %v1267_v11  ;;  %v634_v16 = vmul.f32 %v1267_v11, %v1267_v11 }
 0x284   : > { %617 = vadd.xlane.f32.xlu0 %v1269_v14  ;;  %v633_v19 = vmul.f32 %v1269_v14, %v1269_v14 }
 0x286   : > { %v935_v18 = vpop.f32.mrb[4].mxu1 }
 0x287   : > { %v608_v15 = vpop.f32.mrb[5].mxu1  ;;  %643 = vadd.xlane.f32.xlu1 %v634_v16  ;;  %v1297_v31 = vadd.f32 %v935_v18, %v511_v9 }
 0x288   : > { %641 = vadd.xlane.f32.xlu0 %v633_v19  ;;  %v1299_v33 = vadd.f32 %v608_v15, %v511_v9 }
 0x289   : > { %v640_v35 = vmul.f32 %v1297_v31, %v1297_v31 }
 0x28a   : > { %v639_v37 = vmul.f32 %v1299_v33, %v1299_v33 }
 0x28b   : > { %623 = vadd.xlane.f32.xlu1 %v1277_v17 }
 0x28c   : > { %621 = vadd.xlane.f32.xlu0 %v1279_v22 }
 0x28f   : > { %647 = vadd.xlane.f32.xlu1 %v636_v25 }
 0x290   : > { %645 = vadd.xlane.f32.xlu0 %v635_v27 }
 0x293   : > { %627 = vadd.xlane.f32.xlu1 %v1287_v26 }
 0x294   : > { %625 = vadd.xlane.f32.xlu0 %v1289_v13 }
 0x297   : > { %651 = vadd.xlane.f32.xlu1 %v638_v28 }
 0x298   : > { %649 = vadd.xlane.f32.xlu0 %v637_v30 }
 0x29b   : > { %631 = vadd.xlane.f32.xlu1 %v1297_v31 }
 0x29c   : > { %629 = vadd.xlane.f32.xlu0 %v1299_v33 }
 0x29f   : > { %655 = vadd.xlane.f32.xlu1 %v640_v35 }
 0x2a0   : > { %653 = vadd.xlane.f32.xlu0 %v639_v37 }
 0x310   : > { %v620_v38 = vpop.xlane.xlu1 %619 }
 0x311   : > { %v658_v39 = vmul.f32 0.03125, %v620_v38  ;;  %v618_v41 = vpop.xlane.xlu0 %617 }
 0x312   : > { %v657_v43 = vmul.f32 0.03125, %v618_v41 }
 0x313   : > { %v674_v21 = vmul.f32 %v658_v39, %v658_v39  ;;  %v714_v8 = vsub.f32 %v1267_v11, %v658_v39 }
 0x314   : > { %v644_v32 = vpop.xlane.xlu1 %643  ;;  %v673_v46 = vmul.f32 %v657_v43, %v657_v43  ;;  %v713_v16 = vsub.f32 %v1269_v14, %v657_v43 }
 0x315   : > { %v666_v44 = vmul.f32 0.03125, %v644_v32  ;;  %v642_v45 = vpop.xlane.xlu0 %641 }
 0x316   : > { %v665_v34 = vmul.f32 0.03125, %v642_v45 }
 0x317   : > { %v682_v29 = vsub.f32 %v666_v44, %v674_v21 }
 0x318   : > { %v681_v47 = vsub.f32 %v665_v34, %v673_v46  ;;  %v624_v49 = vpop.xlane.xlu1 %623 }
 0x319   : > { %v690_v50 = vmax.f32 %v682_v29, 0.0  ;;  %v1307_v51 = vmul.f32 0.03125, %v624_v49  ;;  %v622_v52 = vpop.xlane.xlu0 %621 }
 0x31a   : > { %v689_v53 = vmax.f32 %v681_v47, 0.0  ;;  %v1309_v54 = vmul.f32 0.03125, %v622_v52 }
 0x31b   : > { %v698_v57 = vadd.f32 1e-05, %v690_v50  ;;  %v676_v58 = vmul.f32 %v1307_v51, %v1307_v51  ;;  %v716_v43 = vsub.f32 %v1277_v17, %v1307_v51 }
 0x31c   : > { %v697_v23 = vadd.f32 1e-05, %v689_v53  ;;  %v648_v42 = vpop.xlane.xlu1 %647  ;;  %v675_v61 = vmul.f32 %v1309_v54, %v1309_v54  ;;  %v715_v52 = vsub.f32 %v1279_v22, %v1309_v54 }
 0x31d   : > { %1016 = vrsqrt.f32 %v698_v57  ;;  %v668_v59 = vmul.f32 0.03125, %v648_v42  ;;  %v646_v60 = vpop.xlane.xlu0 %645 }
 0x31e   : > { %1018 = vrsqrt.f32 %v697_v23  ;;  %v667_v20 = vmul.f32 0.03125, %v646_v60 }
 0x31f   : > { %v684_v48 = vsub.f32 %v668_v59, %v676_v58 }
 0x320   : > { %v683_v62 = vsub.f32 %v667_v20, %v675_v61  ;;  %v628_v63 = vpop.xlane.xlu1 %627 }
 0x321   : > { %v692_v40 = vmax.f32 %v684_v48, 0.0  ;;  %v1315_v55 = vmul.f32 0.03125, %v628_v63  ;;  %v626_v0 = vpop.xlane.xlu0 %625 }
 0x322   : > { %v691_v1 = vmax.f32 %v683_v62, 0.0  ;;  %v1317_v2 = vmul.f32 0.03125, %v626_v0 }
 0x323   : > { %v700_v3 = vadd.f32 1e-05, %v692_v40  ;;  %v678_v4 = vmul.f32 %v1315_v55, %v1315_v55  ;;  %v718_v40 = vsub.f32 %v1287_v26, %v1315_v55 }
 0x324   : > { %v699_v5 = vadd.f32 1e-05, %v691_v1  ;;  %v652_v36 = vpop.xlane.xlu1 %651  ;;  %v677_v9 = vmul.f32 %v1317_v2, %v1317_v2 }
 0x325   : > { %1020 = vrsqrt.f32 %v700_v3  ;;  %v670_v6 = vmul.f32 0.03125, %v652_v36  ;;  %v650_v7 = vpop.xlane.xlu0 %649  ;;  %v717_v3 = vsub.f32 %v1289_v13, %v1317_v2 }
 0x326   : > { %1022 = vrsqrt.f32 %v699_v5  ;;  %v669_v10 = vmul.f32 0.03125, %v650_v7 }
 0x327   : > { %v1017_v12 = vpop.eup %1016  ;;  %v686_v18 = vsub.f32 %v670_v6, %v678_v4 }
 0x328   : > { %v1019_v19 = vpop.eup %1018  ;;  %v722_v15 = vmul.f32 %v1017_v12, %v714_v8  ;;  %v685_v25 = vsub.f32 %v669_v10, %v677_v9  ;;  %v632_v27 = vpop.xlane.xlu1 %631 }
 0x329   : > { %v721_v28 = vmul.f32 %v1019_v19, %v713_v16  ;;  %v694_v30 = vmax.f32 %v686_v18, 0.0  ;;  %v1325_v35 = vmul.f32 0.03125, %v632_v27  ;;  %v630_v37 = vpop.xlane.xlu0 %629 }
 0x32a   : > { %v730_v11 = vmul.f32 %v722_v15, %v1220_v56  ;;  %v693_v38 = vmax.f32 %v685_v25, 0.0  ;;  %v663_v39 = vmul.f32 0.03125, %v630_v37 }
 0x32b   : > { %v729_v41 = vmul.f32 %v721_v28, %v1220_v56  ;;  %v702_v32 = vadd.f32 1e-05, %v694_v30  ;;  %v680_v46 = vmul.f32 %v1325_v35, %v1325_v35  ;;  %v720_v13 = vsub.f32 %v1297_v31, %v1325_v35 }
 0x32c   : > { %v738_v14 = vadd.f32 %v730_v11, %v1231_v24  ;;  %v701_v21 = vadd.f32 1e-05, %v693_v38  ;;  %v656_v44 = vpop.xlane.xlu1 %655  ;;  %v679_v17 = vmul.f32 %v663_v39, %v663_v39  ;;  %v719_v10 = vsub.f32 %v1299_v33, %v663_v39 }
 0x32d   : > { %v737_v45 = vadd.f32 %v729_v41, %v1231_v24  ;;  %1024 = vrsqrt.f32 %v702_v32  ;;  %v672_v34 = vmul.f32 0.03125, %v656_v44  ;;  %v654_v29 = vpop.xlane.xlu0 %653 }
 0x32e   : > { %v746_v47 = vmax.f32 %v738_v14, 0.0  ;;  %1026 = vrsqrt.f32 %v701_v21  ;;  %v671_v49 = vmul.f32 0.03125, %v654_v29 }
 0x32f   : > { %v1021_v50 = vpop.eup %1020  ;;  %v745_v51 = vmax.f32 %v737_v45, 0.0  ;;  %v688_v53 = vsub.f32 %v672_v34, %v680_v46 }
 0x330   : > { %v1023_v57 = vpop.eup %1022  ;;  %754 = vst [vmem:[%s1337_s18 + $0x8] sm:$0xff] %v746_v47  ;;  %v724_v23 = vmul.f32 %v1021_v50, %v716_v43  ;;  %v687_v42 = vsub.f32 %v671_v49, %v679_v17 }
 0x331   : > { %753 = vst [vmem:[%s1337_s18] sm:$0xff] %v745_v51  ;;  %v723_v58 = vmul.f32 %v1023_v57, %v715_v52  ;;  %v696_v59 = vmax.f32 %v688_v53, 0.0 }
 0x332   : > { %v732_v60 = vmul.f32 %v724_v23, %v1220_v56  ;;  %v695_v61 = vmax.f32 %v687_v42, 0.0 }
 0x333   : > { %v731_v20 = vmul.f32 %v723_v58, %v1220_v56  ;;  %v704_v48 = vadd.f32 1e-05, %v696_v59 }
 0x334   : > { %v740_v62 = vadd.f32 %v732_v60, %v1231_v24  ;;  %v703_v63 = vadd.f32 1e-05, %v695_v61 }
 0x335   : > { %v739_v22 = vadd.f32 %v731_v20, %v1231_v24  ;;  %1028 = vrsqrt.f32 %v704_v48 }
 0x336   : > { %v748_v54 = vmax.f32 %v740_v62, 0.0  ;;  %1030 = vrsqrt.f32 %v703_v63 }
 0x337   : > { %v1025_v0 = vpop.eup %1024  ;;  %v747_v1 = vmax.f32 %v739_v22, 0.0 }
 0x338   : > { %v1027_v5 = vpop.eup %1026  ;;  %756 = vst [vmem:[%s1337_s18 + $0x18] sm:$0xff] %v748_v54  ;;  %v726_v36 = vmul.f32 %v1025_v0, %v718_v40 }
 0x339   : > { %755 = vst [vmem:[%s1337_s18 + $0x10] sm:$0xff] %v747_v1  ;;  %v725_v4 = vmul.f32 %v1027_v5, %v717_v3 }
 0x33a   : > { %v734_v6 = vmul.f32 %v726_v36, %v1220_v56 }
 0x33b   : > { %v733_v7 = vmul.f32 %v725_v4, %v1220_v56 }
 0x33c   : > { %v742_v8 = vadd.f32 %v734_v6, %v1231_v24 }
 0x33d   : > { %v741_v26 = vadd.f32 %v733_v7, %v1231_v24 }
 0x33e   : > { %v750_v55 = vmax.f32 %v742_v8, 0.0 }
 0x33f   : > { %v1029_v2 = vpop.eup %1028  ;;  %v749_v9 = vmax.f32 %v741_v26, 0.0 }
 0x340   : > { %v1031_v12 = vpop.eup %1030  ;;  %758 = vst [vmem:[%s1337_s18 + $0x28] sm:$0xff] %v750_v55  ;;  %v728_v16 = vmul.f32 %v1029_v2, %v720_v13 }
 0x341   : > { %757 = vst [vmem:[%s1337_s18 + $0x20] sm:$0xff] %v749_v9  ;;  %v727_v18 = vmul.f32 %v1031_v12, %v719_v10 }
 0x342   : > { %v736_v19 = vmul.f32 %v728_v16, %v1220_v56 }
 0x343   : > { %v735_v15 = vmul.f32 %v727_v18, %v1220_v56 }
 0x344   : > { %v744_v25 = vadd.f32 %v736_v19, %v1231_v24 }
 0x345   : > { %v743_v27 = vadd.f32 %v735_v15, %v1231_v24 }
 0x346   : > { %v752_v28 = vmax.f32 %v744_v25, 0.0 }
 0x347   : > { %v751_v31 = vmax.f32 %v743_v27, 0.0 }
 0x348   : > { %760 = vst [vmem:[%s1337_s18 + $0x38] sm:$0xff] %v752_v28 }
 0x349   : > { %759 = vst [vmem:[%s1337_s18 + $0x30] sm:$0xff] %v751_v31 }
 0x34a PF: > { %s14_s15 = sadd.s32 1, %s1038_s15  }
 0x34b   : > { %p11_p4 = scmp.ge.s32.totalorder %s14_s15, 4  }
 0x34d   :  { %13 = sbr.rel (!%p11_p4) target bundleno = 1 (0x1), region = 66 }

</bundles_post_ra>
